<compile_context>
chip_gen: v6e
topology: v6e:2x2x1
jax: 0.10.0
libtpu: 0.0.40
codegen_flags: <defaults>
</compile_context>

<pallas_src>
import jax
import jax.numpy as jnp
from jax.experimental import pallas as pl
from jax.experimental.pallas import tpu as pltpu


def _round_up(x, m):
    return ((x + m - 1) // m) * m


def _gru_kernel(x_ref, wih_ref, whh_ref, bih_ref, bhh_ref,
                out_ref, h_ref, gx_ref):
    # x_ref   : (Tc*Bp, I)    this chunk's inputs (time-major, Bp rows / step)
    # wih_ref : (I,  3*Hp)    packed W_ih^T, gates at column offsets 0/Hp/2Hp
    # whh_ref : (Hp, 3*Hp)    packed W_hh^T, same column layout
    # bih_ref : (1,  3*Hp)
    # bhh_ref : (1,  3*Hp)
    # out_ref : (Tc*Bp, Hp)   this chunk's per-timestep hidden outputs
    # h_ref   : (Bp, Hp)      persistent VMEM scratch: hidden state carry
    # gx_ref  : (Tc*Bp, 3*Hp) VMEM scratch: precomputed input gates
    Bp, Hp = h_ref.shape
    Tc = out_ref.shape[0] // Bp

    @pl.when(pl.program_id(0) == 0)
    def _():
        h_ref[...] = jnp.zeros_like(h_ref)

    # Phase 1: input->hidden projection for the whole chunk (one MXU matmul,
    # independent of h, hoisted out of the recurrence).
    gx_ref[...] = (
        jnp.dot(x_ref[...], wih_ref[...], preferred_element_type=jnp.float32)
        + bih_ref[...])

    # Hoist the (Hp, 3Hp) weight read and bias broadcast out of the serial loop.
    whh = whh_ref[...]
    bhh = jnp.broadcast_to(bhh_ref[...], (Bp, 3 * Hp))

    def sigmoid(v):
        # One EUP push (tanh) instead of exp + reciprocal.
        return 0.5 * jnp.tanh(0.5 * v) + 0.5

    def step(i, h):
        row = pl.multiple_of(i * Bp, Bp)
        gx = gx_ref[pl.ds(row, Bp), :]                               # (Bp, 3Hp)
        gh = jnp.dot(h, whh, preferred_element_type=jnp.float32) + bhh
        r = sigmoid(gx[:, 0:Hp] + gh[:, 0:Hp])
        z = sigmoid(gx[:, Hp:2 * Hp] + gh[:, Hp:2 * Hp])
        n = jnp.tanh(gx[:, 2 * Hp:3 * Hp] + r * gh[:, 2 * Hp:3 * Hp])
        h_new = n + z * (h - n)                                      # == (1-z)*n + z*h
        out_ref[pl.ds(row, Bp), :] = h_new.astype(out_ref.dtype)
        return h_new

    h0 = h_ref[...]
    h_last = jax.lax.fori_loop(0, Tc, step, h0, unroll=min(Tc, 8))
    h_ref[...] = h_last


def gru_encoder_forward(x, w_ih, w_hh, b_ih, b_hh, *, time_chunk=4):
    """Single-layer GRU forward (PyTorch nn.GRU semantics, h0 = 0).

    x: (T, B, I); w_ih: (3H, I); w_hh: (3H, H); b_ih, b_hh: (3H,).
    Returns (gru_output (T, B, H), state (1, B, H)).
    """
    T, B, I = x.shape
    H = w_hh.shape[1]
    Hp = _round_up(H, 128)          # lane-aligned gate width (128-lane vreg)
    Bp = _round_up(B, 8)            # sublane granule; batch >=128 real rows
                                    # per call is the way to fill the MXU.
    Tc = max(1, min(time_chunk, T))
    Tp = _round_up(T, Tc)
    n_chunks = Tp // Tc

    f32 = jnp.float32

    def pack_gates(w, rows, rows_pad):
        # w: (3H, rows), PyTorch row blocks (r, z, n) -> (rows_pad, 3*Hp),
        # gate g occupies columns [g*Hp, g*Hp + H); everything else is zero.
        out = jnp.zeros((rows_pad, 3 * Hp), f32)
        for g in range(3):
            out = out.at[:rows, g * Hp:g * Hp + H].set(
                w[g * H:(g + 1) * H, :].astype(f32).T)
        return out

    def pack_bias(b):
        out = jnp.zeros((1, 3 * Hp), f32)
        for g in range(3):
            out = out.at[0, g * Hp:g * Hp + H].set(b[g * H:(g + 1) * H].astype(f32))
        return out

    w_ih_p = pack_gates(w_ih, I, I)      # (I,  3Hp)
    w_hh_p = pack_gates(w_hh, H, Hp)     # (Hp, 3Hp)  (pad rows zero)
    b_ih_p = pack_bias(b_ih)             # (1,  3Hp)
    b_hh_p = pack_bias(b_hh)             # (1,  3Hp)

    # Pad time to a chunk multiple and batch to the sublane granule; flatten to
    # time-major row blocks of Bp rows per timestep.
    x_p = jnp.pad(x.astype(f32), ((0, Tp - T), (0, Bp - B), (0, 0)))
    x_flat = x_p.reshape(Tp * Bp, I)

    # Per-chunk VMEM working set (x/out double-buffered) + weights + scratch.
    est_bytes = 4 * (2 * Tc * Bp * I + 2 * Tc * Bp * Hp
                     + I * 3 * Hp + Hp * 3 * Hp + 2 * 3 * Hp
                     + Bp * Hp + Tc * Bp * 3 * Hp)
    vmem_limit = int(min(max(2 * est_bytes, 16 * 2**20), 48 * 2**20))

    out_flat = pl.pallas_call(
        _gru_kernel,
        out_shape=jax.ShapeDtypeStruct((Tp * Bp, Hp), f32),
        grid_spec=pltpu.PrefetchScalarGridSpec(
            num_scalar_prefetch=0,
            grid=(n_chunks,),
            in_specs=[
                pl.BlockSpec((Tc * Bp, I), lambda t: (t, 0)),     # x chunk
                pl.BlockSpec((I, 3 * Hp), lambda t: (0, 0)),      # W_ih^T
                pl.BlockSpec((Hp, 3 * Hp), lambda t: (0, 0)),     # W_hh^T
                pl.BlockSpec((1, 3 * Hp), lambda t: (0, 0)),      # b_ih
                pl.BlockSpec((1, 3 * Hp), lambda t: (0, 0)),      # b_hh
            ],
            out_specs=pl.BlockSpec((Tc * Bp, Hp), lambda t: (t, 0)),
            scratch_shapes=[
                pltpu.VMEM((Bp, Hp), jnp.float32),                # h carry
                pltpu.VMEM((Tc * Bp, 3 * Hp), jnp.float32),       # gx chunk
            ]),
        compiler_params=pltpu.CompilerParams(
            dimension_semantics=("arbitrary",),                   # serial time
            vmem_limit_bytes=vmem_limit),
    )(x_flat, w_ih_p, w_hh_p, b_ih_p, b_hh_p)

    out3 = out_flat.reshape(Tp, Bp, Hp)
    gru_output = out3[:T, :B, :H].astype(x.dtype)
    # Single-layer unidirectional GRU: h_n == output at the last real timestep
    # (robust to time padding).
    state = gru_output[T - 1][None]                               # (1, B, H)
    return gru_output, state


def _gru_reference(x, w_ih, w_hh, b_ih, b_hh):
    """Plain-JAX reference matching PyTorch nn.GRU semantics."""
    T, B, I = x.shape
    H = w_hh.shape[1]
    w_ir, w_iz, w_in = jnp.split(w_ih, 3, axis=0)
    w_hr, w_hz, w_hn = jnp.split(w_hh, 3, axis=0)
    b_ir, b_iz, b_in = jnp.split(b_ih, 3)
    b_hr, b_hz, b_hn = jnp.split(b_hh, 3)

    def step(h, x_t):
        r = jax.nn.sigmoid(x_t @ w_ir.T + b_ir + h @ w_hr.T + b_hr)
        z = jax.nn.sigmoid(x_t @ w_iz.T + b_iz + h @ w_hz.T + b_hz)
        n = jnp.tanh(x_t @ w_in.T + b_in + r * (h @ w_hn.T + b_hn))
        h_new = (1.0 - z) * n + z * h
        return h_new, h_new

    h0 = jnp.zeros((B, H), x.dtype)
    h_last, outs = jax.lax.scan(step, h0, x)
    return outs, h_last[None]


if __name__ == "__main__":
    T, B, I, H = 8, 4, 16, 32   # seq=8, batch=4, input_size=16, hidden_size=32

    key = jax.random.PRNGKey(0)
    kx, k1, k2, k3, k4 = jax.random.split(key, 5)
    bound = 1.0 / (H ** 0.5)    # PyTorch GRU default init: U(-1/sqrt(H), 1/sqrt(H))

    x = jax.random.normal(kx, (T, B, I), dtype=jnp.float32)
    w_ih = jax.random.uniform(k1, (3 * H, I), jnp.float32, -bound, bound)
    w_hh = jax.random.uniform(k2, (3 * H, H), jnp.float32, -bound, bound)
    b_ih = jax.random.uniform(k3, (3 * H,), jnp.float32, -bound, bound)
    b_hh = jax.random.uniform(k4, (3 * H,), jnp.float32, -bound, bound)

    ref_out, ref_state = _gru_reference(x, w_ih, w_hh, b_ih, b_hh)

    # Default chunking: Tc=4 -> grid of 2 chunks (exercises the VMEM h carry).
    gru_out, state = jax.block_until_ready(
        gru_encoder_forward(x, w_ih, w_hh, b_ih, b_hh))
    assert gru_out.shape == (T, B, H) and state.shape == (1, B, H)
    assert jnp.allclose(gru_out, ref_out, atol=1e-5, rtol=1e-5)
    assert jnp.allclose(state, ref_state, atol=1e-5, rtol=1e-5)

    # Non-divisor chunk: Tc=3 -> T padded to 9 (exercises the padded-time path).
    gru_out2, state2 = jax.block_until_ready(
        gru_encoder_forward(x, w_ih, w_hh, b_ih, b_hh, time_chunk=3))
    assert jnp.allclose(gru_out2, ref_out, atol=1e-5, rtol=1e-5)
    assert jnp.allclose(state2, ref_state, atol=1e-5, rtol=1e-5)

    print("KERNEL_OK")
</pallas_src>

<mosaic_0001>
module attributes {stable_mosaic.version = 11 : i64} {
  func.func @_gru_kernel(%arg0: i32, %arg1: memref<32x16xf32, #tpu.memory_space<vmem>>, %arg2: memref<16x384xf32, #tpu.memory_space<vmem>>, %arg3: memref<128x384xf32, #tpu.memory_space<vmem>>, %arg4: memref<1x384xf32, #tpu.memory_space<vmem>>, %arg5: memref<1x384xf32, #tpu.memory_space<vmem>>, %arg6: memref<32x128xf32, #tpu.memory_space<vmem>>, %arg7: memref<8x128xf32, #tpu.memory_space<vmem>>, %arg8: memref<32x384xf32, #tpu.memory_space<vmem>>) attributes {dimension_semantics = [#tpu.dimension_semantics<arbitrary>], iteration_bounds = array<i64: 2>, scalar_prefetch = 0 : i64, scratch_operands = 2 : i64, tpu.core_type = #tpu.core_type<tc>, window_params = [{transform_indices = @transform_0, window_bounds = array<i64: 32, 16>}, {pipeline_mode = #tpu.pipeline_mode<synchronous>, transform_indices = @transform_1, window_bounds = array<i64: 16, 384>}, {pipeline_mode = #tpu.pipeline_mode<synchronous>, transform_indices = @transform_2, window_bounds = array<i64: 128, 384>}, {pipeline_mode = #tpu.pipeline_mode<synchronous>, transform_indices = @transform_3, window_bounds = array<i64: 1, 384>}, {pipeline_mode = #tpu.pipeline_mode<synchronous>, transform_indices = @transform_4, window_bounds = array<i64: 1, 384>}, {transform_indices = @transform_5, window_bounds = array<i64: 32, 128>}]} {
    %c0_i32 = arith.constant 0 : i32
    %0 = arith.cmpi eq, %arg0, %c0_i32 : i32
    %1 = arith.extui %0 : i1 to i32
    %c0_i32_0 = arith.constant 0 : i32
    %2 = arith.cmpi ne, %1, %c0_i32_0 : i32
    scf.if %2 {
      %cst_56 = arith.constant 0.000000e+00 : f32
      %160 = vector.broadcast %cst_56 : f32 to vector<8x128xf32>
      %c0_57 = arith.constant 0 : index
      %c0_58 = arith.constant 0 : index
      %161 = vector.load %arg7[%c0_57, %c0_58] : memref<8x128xf32, #tpu.memory_space<vmem>>, vector<8x128xf32>
      tpu.vector_store %arg7[%c0_57, %c0_58], %160 {strides = array<i32>} : memref<8x128xf32, #tpu.memory_space<vmem>>, vector<8x128xf32>,
    } else {
    }
    %c0 = arith.constant 0 : index
    %c0_1 = arith.constant 0 : index
    %3 = vector.load %arg1[%c0, %c0_1] : memref<32x16xf32, #tpu.memory_space<vmem>>, vector<32x16xf32>
    %c0_2 = arith.constant 0 : index
    %c0_3 = arith.constant 0 : index
    %4 = vector.load %arg2[%c0_2, %c0_3] : memref<16x384xf32, #tpu.memory_space<vmem>>, vector<16x384xf32>
    %cst = arith.constant dense<0.000000e+00> : vector<32x384xf32>
    %5 = tpu.matmul %3, %4, %cst {dimension_numbers = #tpu.dot_dimension_numbers<[1], [0], [0], [1], [0, 0, 1, 1], [], []>} : vector<32x16xf32>, vector<16x384xf32>, vector<32x384xf32> -> vector<32x384xf32>
    %c0_4 = arith.constant 0 : index
    %c0_5 = arith.constant 0 : index
    %6 = vector.load %arg4[%c0_4, %c0_5] : memref<1x384xf32, #tpu.memory_space<vmem>>, vector<1x384xf32>
    %7 = vector.broadcast %6 : vector<1x384xf32> to vector<32x384xf32>
    %8 = arith.addf %5, %7 : vector<32x384xf32>
    %c0_6 = arith.constant 0 : index
    %c0_7 = arith.constant 0 : index
    %9 = vector.load %arg8[%c0_6, %c0_7] : memref<32x384xf32, #tpu.memory_space<vmem>>, vector<32x384xf32>
    tpu.vector_store %arg8[%c0_6, %c0_7], %8 {strides = array<i32>} : memref<32x384xf32, #tpu.memory_space<vmem>>, vector<32x384xf32>,
    %c0_8 = arith.constant 0 : index
    %c0_9 = arith.constant 0 : index
    %10 = vector.load %arg3[%c0_8, %c0_9] : memref<128x384xf32, #tpu.memory_space<vmem>>, vector<128x384xf32>
    %c0_10 = arith.constant 0 : index
    %c0_11 = arith.constant 0 : index
    %11 = vector.load %arg5[%c0_10, %c0_11] : memref<1x384xf32, #tpu.memory_space<vmem>>, vector<1x384xf32>
    %12 = vector.shape_cast %11 : vector<1x384xf32> to vector<1x384xf32>
    %13 = vector.broadcast %12 : vector<1x384xf32> to vector<8x384xf32>
    %c0_12 = arith.constant 0 : index
    %c0_13 = arith.constant 0 : index
    %14 = vector.load %arg7[%c0_12, %c0_13] : memref<8x128xf32, #tpu.memory_space<vmem>>, vector<8x128xf32>
    %c0_i32_14 = arith.constant 0 : i32
    %c8_i32 = arith.constant 8 : i32
    %15 = arith.muli %c0_i32_14, %c8_i32 : i32
    %16 = tpu.assume_multiple %15, 8 : i32
    %17 = arith.index_cast %16 : i32 to index
    %c0_15 = arith.constant 0 : index
    %18 = vector.load %arg8[%17, %c0_15] : memref<32x384xf32, #tpu.memory_space<vmem>>, vector<8x384xf32>
    %cst_16 = arith.constant dense<0.000000e+00> : vector<8x384xf32>
    %19 = tpu.matmul %14, %10, %cst_16 {dimension_numbers = #tpu.dot_dimension_numbers<[1], [0], [0], [1], [0, 0, 1, 1], [], []>} : vector<8x128xf32>, vector<128x384xf32>, vector<8x384xf32> -> vector<8x384xf32>
    %20 = arith.addf %19, %13 : vector<8x384xf32>
    %21 = vector.extract_strided_slice %18 {offsets = [0, 0], sizes = [8, 128], strides = [1, 1]} : vector<8x384xf32> to vector<8x128xf32>
    %22 = vector.extract_strided_slice %20 {offsets = [0, 0], sizes = [8, 128], strides = [1, 1]} : vector<8x384xf32> to vector<8x128xf32>
    %23 = arith.addf %21, %22 : vector<8x128xf32>
    %cst_17 = arith.constant 5.000000e-01 : f32
    %24 = vector.broadcast %cst_17 : f32 to vector<8x128xf32>
    %25 = arith.mulf %24, %23 : vector<8x128xf32>
    %26 = math.tanh %25 : vector<8x128xf32>
    %cst_18 = arith.constant 5.000000e-01 : f32
    %27 = vector.broadcast %cst_18 : f32 to vector<8x128xf32>
    %28 = arith.mulf %27, %26 : vector<8x128xf32>
    %cst_19 = arith.constant 5.000000e-01 : f32
    %29 = vector.broadcast %cst_19 : f32 to vector<8x128xf32>
    %30 = arith.addf %28, %29 : vector<8x128xf32>
    %31 = vector.extract_strided_slice %18 {offsets = [0, 128], sizes = [8, 128], strides = [1, 1]} : vector<8x384xf32> to vector<8x128xf32>
    %32 = vector.extract_strided_slice %20 {offsets = [0, 128], sizes = [8, 128], strides = [1, 1]} : vector<8x384xf32> to vector<8x128xf32>
    %33 = arith.addf %31, %32 : vector<8x128xf32>
    %cst_20 = arith.constant 5.000000e-01 : f32
    %34 = vector.broadcast %cst_20 : f32 to vector<8x128xf32>
    %35 = arith.mulf %34, %33 : vector<8x128xf32>
    %36 = math.tanh %35 : vector<8x128xf32>
    %cst_21 = arith.constant 5.000000e-01 : f32
    %37 = vector.broadcast %cst_21 : f32 to vector<8x128xf32>
    %38 = arith.mulf %37, %36 : vector<8x128xf32>
    %cst_22 = arith.constant 5.000000e-01 : f32
    %39 = vector.broadcast %cst_22 : f32 to vector<8x128xf32>
    %40 = arith.addf %38, %39 : vector<8x128xf32>
    %41 = vector.extract_strided_slice %18 {offsets = [0, 256], sizes = [8, 128], strides = [1, 1]} : vector<8x384xf32> to vector<8x128xf32>
    %42 = vector.extract_strided_slice %20 {offsets = [0, 256], sizes = [8, 128], strides = [1, 1]} : vector<8x384xf32> to vector<8x128xf32>
    %43 = arith.mulf %30, %42 : vector<8x128xf32>
    %44 = arith.addf %41, %43 : vector<8x128xf32>
    %45 = math.tanh %44 : vector<8x128xf32>
    %46 = arith.subf %14, %45 : vector<8x128xf32>
    %47 = arith.mulf %40, %46 : vector<8x128xf32>
    %48 = arith.addf %45, %47 : vector<8x128xf32>
    %49 = arith.index_cast %16 : i32 to index
    %c0_23 = arith.constant 0 : index
    %50 = vector.load %arg6[%49, %c0_23] : memref<32x128xf32, #tpu.memory_space<vmem>>, vector<8x128xf32>
    tpu.vector_store %arg6[%49, %c0_23], %48 {strides = array<i32>} : memref<32x128xf32, #tpu.memory_space<vmem>>, vector<8x128xf32>,
    %c1_i32 = arith.constant 1 : i32
    %c8_i32_24 = arith.constant 8 : i32
    %51 = arith.muli %c1_i32, %c8_i32_24 : i32
    %52 = tpu.assume_multiple %51, 8 : i32
    %53 = arith.index_cast %52 : i32 to index
    %c0_25 = arith.constant 0 : index
    %54 = vector.load %arg8[%53, %c0_25] : memref<32x384xf32, #tpu.memory_space<vmem>>, vector<8x384xf32>
    %cst_26 = arith.constant dense<0.000000e+00> : vector<8x384xf32>
    %55 = tpu.matmul %48, %10, %cst_26 {dimension_numbers = #tpu.dot_dimension_numbers<[1], [0], [0], [1], [0, 0, 1, 1], [], []>} : vector<8x128xf32>, vector<128x384xf32>, vector<8x384xf32> -> vector<8x384xf32>
    %56 = arith.addf %55, %13 : vector<8x384xf32>
    %57 = vector.extract_strided_slice %54 {offsets = [0, 0], sizes = [8, 128], strides = [1, 1]} : vector<8x384xf32> to vector<8x128xf32>
    %58 = vector.extract_strided_slice %56 {offsets = [0, 0], sizes = [8, 128], strides = [1, 1]} : vector<8x384xf32> to vector<8x128xf32>
    %59 = arith.addf %57, %58 : vector<8x128xf32>
    %cst_27 = arith.constant 5.000000e-01 : f32
    %60 = vector.broadcast %cst_27 : f32 to vector<8x128xf32>
    %61 = arith.mulf %60, %59 : vector<8x128xf32>
    %62 = math.tanh %61 : vector<8x128xf32>
    %cst_28 = arith.constant 5.000000e-01 : f32
    %63 = vector.broadcast %cst_28 : f32 to vector<8x128xf32>
    %64 = arith.mulf %63, %62 : vector<8x128xf32>
    %cst_29 = arith.constant 5.000000e-01 : f32
    %65 = vector.broadcast %cst_29 : f32 to vector<8x128xf32>
    %66 = arith.addf %64, %65 : vector<8x128xf32>
    %67 = vector.extract_strided_slice %54 {offsets = [0, 128], sizes = [8, 128], strides = [1, 1]} : vector<8x384xf32> to vector<8x128xf32>
    %68 = vector.extract_strided_slice %56 {offsets = [0, 128], sizes = [8, 128], strides = [1, 1]} : vector<8x384xf32> to vector<8x128xf32>
    %69 = arith.addf %67, %68 : vector<8x128xf32>
    %cst_30 = arith.constant 5.000000e-01 : f32
    %70 = vector.broadcast %cst_30 : f32 to vector<8x128xf32>
    %71 = arith.mulf %70, %69 : vector<8x128xf32>
    %72 = math.tanh %71 : vector<8x128xf32>
    %cst_31 = arith.constant 5.000000e-01 : f32
    %73 = vector.broadcast %cst_31 : f32 to vector<8x128xf32>
    %74 = arith.mulf %73, %72 : vector<8x128xf32>
    %cst_32 = arith.constant 5.000000e-01 : f32
    %75 = vector.broadcast %cst_32 : f32 to vector<8x128xf32>
    %76 = arith.addf %74, %75 : vector<8x128xf32>
    %77 = vector.extract_strided_slice %54 {offsets = [0, 256], sizes = [8, 128], strides = [1, 1]} : vector<8x384xf32> to vector<8x128xf32>
    %78 = vector.extract_strided_slice %56 {offsets = [0, 256], sizes = [8, 128], strides = [1, 1]} : vector<8x384xf32> to vector<8x128xf32>
    %79 = arith.mulf %66, %78 : vector<8x128xf32>
    %80 = arith.addf %77, %79 : vector<8x128xf32>
    %81 = math.tanh %80 : vector<8x128xf32>
    %82 = arith.subf %48, %81 : vector<8x128xf32>
    %83 = arith.mulf %76, %82 : vector<8x128xf32>
    %84 = arith.addf %81, %83 : vector<8x128xf32>
    %85 = arith.index_cast %52 : i32 to index
    %c0_33 = arith.constant 0 : index
    %86 = vector.load %arg6[%85, %c0_33] : memref<32x128xf32, #tpu.memory_space<vmem>>, vector<8x128xf32>
    tpu.vector_store %arg6[%85, %c0_33], %84 {strides = array<i32>} : memref<32x128xf32, #tpu.memory_space<vmem>>, vector<8x128xf32>,
    %c2_i32 = arith.constant 2 : i32
    %c8_i32_34 = arith.constant 8 : i32
    %87 = arith.muli %c2_i32, %c8_i32_34 : i32
    %88 = tpu.assume_multiple %87, 8 : i32
    %89 = arith.index_cast %88 : i32 to index
    %c0_35 = arith.constant 0 : index
    %90 = vector.load %arg8[%89, %c0_35] : memref<32x384xf32, #tpu.memory_space<vmem>>, vector<8x384xf32>
    %cst_36 = arith.constant dense<0.000000e+00> : vector<8x384xf32>
    %91 = tpu.matmul %84, %10, %cst_36 {dimension_numbers = #tpu.dot_dimension_numbers<[1], [0], [0], [1], [0, 0, 1, 1], [], []>} : vector<8x128xf32>, vector<128x384xf32>, vector<8x384xf32> -> vector<8x384xf32>
    %92 = arith.addf %91, %13 : vector<8x384xf32>
    %93 = vector.extract_strided_slice %90 {offsets = [0, 0], sizes = [8, 128], strides = [1, 1]} : vector<8x384xf32> to vector<8x128xf32>
    %94 = vector.extract_strided_slice %92 {offsets = [0, 0], sizes = [8, 128], strides = [1, 1]} : vector<8x384xf32> to vector<8x128xf32>
    %95 = arith.addf %93, %94 : vector<8x128xf32>
    %cst_37 = arith.constant 5.000000e-01 : f32
    %96 = vector.broadcast %cst_37 : f32 to vector<8x128xf32>
    %97 = arith.mulf %96, %95 : vector<8x128xf32>
    %98 = math.tanh %97 : vector<8x128xf32>
    %cst_38 = arith.constant 5.000000e-01 : f32
    %99 = vector.broadcast %cst_38 : f32 to vector<8x128xf32>
    %100 = arith.mulf %99, %98 : vector<8x128xf32>
    %cst_39 = arith.constant 5.000000e-01 : f32
    %101 = vector.broadcast %cst_39 : f32 to vector<8x128xf32>
    %102 = arith.addf %100, %101 : vector<8x128xf32>
    %103 = vector.extract_strided_slice %90 {offsets = [0, 128], sizes = [8, 128], strides = [1, 1]} : vector<8x384xf32> to vector<8x128xf32>
    %104 = vector.extract_strided_slice %92 {offsets = [0, 128], sizes = [8, 128], strides = [1, 1]} : vector<8x384xf32> to vector<8x128xf32>
    %105 = arith.addf %103, %104 : vector<8x128xf32>
    %cst_40 = arith.constant 5.000000e-01 : f32
    %106 = vector.broadcast %cst_40 : f32 to vector<8x128xf32>
    %107 = arith.mulf %106, %105 : vector<8x128xf32>
    %108 = math.tanh %107 : vector<8x128xf32>
    %cst_41 = arith.constant 5.000000e-01 : f32
    %109 = vector.broadcast %cst_41 : f32 to vector<8x128xf32>
    %110 = arith.mulf %109, %108 : vector<8x128xf32>
    %cst_42 = arith.constant 5.000000e-01 : f32
    %111 = vector.broadcast %cst_42 : f32 to vector<8x128xf32>
    %112 = arith.addf %110, %111 : vector<8x128xf32>
    %113 = vector.extract_strided_slice %90 {offsets = [0, 256], sizes = [8, 128], strides = [1, 1]} : vector<8x384xf32> to vector<8x128xf32>
    %114 = vector.extract_strided_slice %92 {offsets = [0, 256], sizes = [8, 128], strides = [1, 1]} : vector<8x384xf32> to vector<8x128xf32>
    %115 = arith.mulf %102, %114 : vector<8x128xf32>
    %116 = arith.addf %113, %115 : vector<8x128xf32>
    %117 = math.tanh %116 : vector<8x128xf32>
    %118 = arith.subf %84, %117 : vector<8x128xf32>
    %119 = arith.mulf %112, %118 : vector<8x128xf32>
    %120 = arith.addf %117, %119 : vector<8x128xf32>
    %121 = arith.index_cast %88 : i32 to index
    %c0_43 = arith.constant 0 : index
    %122 = vector.load %arg6[%121, %c0_43] : memref<32x128xf32, #tpu.memory_space<vmem>>, vector<8x128xf32>
    tpu.vector_store %arg6[%121, %c0_43], %120 {strides = array<i32>} : memref<32x128xf32, #tpu.memory_space<vmem>>, vector<8x128xf32>,
    %c3_i32 = arith.constant 3 : i32
    %c8_i32_44 = arith.constant 8 : i32
    %123 = arith.muli %c3_i32, %c8_i32_44 : i32
    %124 = tpu.assume_multiple %123, 8 : i32
    %125 = arith.index_cast %124 : i32 to index
    %c0_45 = arith.constant 0 : index
    %126 = vector.load %arg8[%125, %c0_45] : memref<32x384xf32, #tpu.memory_space<vmem>>, vector<8x384xf32>
    %cst_46 = arith.constant dense<0.000000e+00> : vector<8x384xf32>
    %127 = tpu.matmul %120, %10, %cst_46 {dimension_numbers = #tpu.dot_dimension_numbers<[1], [0], [0], [1], [0, 0, 1, 1], [], []>} : vector<8x128xf32>, vector<128x384xf32>, vector<8x384xf32> -> vector<8x384xf32>
    %128 = arith.addf %127, %13 : vector<8x384xf32>
    %129 = vector.extract_strided_slice %126 {offsets = [0, 0], sizes = [8, 128], strides = [1, 1]} : vector<8x384xf32> to vector<8x128xf32>
    %130 = vector.extract_strided_slice %128 {offsets = [0, 0], sizes = [8, 128], strides = [1, 1]} : vector<8x384xf32> to vector<8x128xf32>
    %131 = arith.addf %129, %130 : vector<8x128xf32>
    %cst_47 = arith.constant 5.000000e-01 : f32
    %132 = vector.broadcast %cst_47 : f32 to vector<8x128xf32>
    %133 = arith.mulf %132, %131 : vector<8x128xf32>
    %134 = math.tanh %133 : vector<8x128xf32>
    %cst_48 = arith.constant 5.000000e-01 : f32
    %135 = vector.broadcast %cst_48 : f32 to vector<8x128xf32>
    %136 = arith.mulf %135, %134 : vector<8x128xf32>
    %cst_49 = arith.constant 5.000000e-01 : f32
    %137 = vector.broadcast %cst_49 : f32 to vector<8x128xf32>
    %138 = arith.addf %136, %137 : vector<8x128xf32>
    %139 = vector.extract_strided_slice %126 {offsets = [0, 128], sizes = [8, 128], strides = [1, 1]} : vector<8x384xf32> to vector<8x128xf32>
    %140 = vector.extract_strided_slice %128 {offsets = [0, 128], sizes = [8, 128], strides = [1, 1]} : vector<8x384xf32> to vector<8x128xf32>
    %141 = arith.addf %139, %140 : vector<8x128xf32>
    %cst_50 = arith.constant 5.000000e-01 : f32
    %142 = vector.broadcast %cst_50 : f32 to vector<8x128xf32>
    %143 = arith.mulf %142, %141 : vector<8x128xf32>
    %144 = math.tanh %143 : vector<8x128xf32>
    %cst_51 = arith.constant 5.000000e-01 : f32
    %145 = vector.broadcast %cst_51 : f32 to vector<8x128xf32>
    %146 = arith.mulf %145, %144 : vector<8x128xf32>
    %cst_52 = arith.constant 5.000000e-01 : f32
    %147 = vector.broadcast %cst_52 : f32 to vector<8x128xf32>
    %148 = arith.addf %146, %147 : vector<8x128xf32>
    %149 = vector.extract_strided_slice %126 {offsets = [0, 256], sizes = [8, 128], strides = [1, 1]} : vector<8x384xf32> to vector<8x128xf32>
    %150 = vector.extract_strided_slice %128 {offsets = [0, 256], sizes = [8, 128], strides = [1, 1]} : vector<8x384xf32> to vector<8x128xf32>
    %151 = arith.mulf %138, %150 : vector<8x128xf32>
    %152 = arith.addf %149, %151 : vector<8x128xf32>
    %153 = math.tanh %152 : vector<8x128xf32>
    %154 = arith.subf %120, %153 : vector<8x128xf32>
    %155 = arith.mulf %148, %154 : vector<8x128xf32>
    %156 = arith.addf %153, %155 : vector<8x128xf32>
    %157 = arith.index_cast %124 : i32 to index
    %c0_53 = arith.constant 0 : index
    %158 = vector.load %arg6[%157, %c0_53] : memref<32x128xf32, #tpu.memory_space<vmem>>, vector<8x128xf32>
    tpu.vector_store %arg6[%157, %c0_53], %156 {strides = array<i32>} : memref<32x128xf32, #tpu.memory_space<vmem>>, vector<8x128xf32>,
    %c4_i32 = arith.constant 4 : i32
    %c0_54 = arith.constant 0 : index
    %c0_55 = arith.constant 0 : index
    %159 = vector.load %arg7[%c0_54, %c0_55] : memref<8x128xf32, #tpu.memory_space<vmem>>, vector<8x128xf32>
    tpu.vector_store %arg7[%c0_54, %c0_55], %156 {strides = array<i32>} : memref<8x128xf32, #tpu.memory_space<vmem>>, vector<8x128xf32>,
    return
  }
  func.func @transform_0(%arg0: i32) -> (i32, i32) {
    %c0_i32 = arith.constant 0 : i32
    %c0_i32_0 = arith.constant 0 : i32
    return %arg0, %c0_i32 : i32, i32
  }
  func.func @transform_1(%arg0: i32) -> (i32, i32) {
    %c0_i32 = arith.constant 0 : i32
    %c0_i32_0 = arith.constant 0 : i32
    %c0_i32_1 = arith.constant 0 : i32
    return %c0_i32, %c0_i32_0 : i32, i32
  }
  func.func @transform_2(%arg0: i32) -> (i32, i32) {
    %c0_i32 = arith.constant 0 : i32
    %c0_i32_0 = arith.constant 0 : i32
    %c0_i32_1 = arith.constant 0 : i32
    return %c0_i32, %c0_i32_0 : i32, i32
  }
  func.func @transform_3(%arg0: i32) -> (i32, i32) {
    %c0_i32 = arith.constant 0 : i32
    %c0_i32_0 = arith.constant 0 : i32
    %c0_i32_1 = arith.constant 0 : i32
    return %c0_i32, %c0_i32_0 : i32, i32
  }
  func.func @transform_4(%arg0: i32) -> (i32, i32) {
    %c0_i32 = arith.constant 0 : i32
    %c0_i32_0 = arith.constant 0 : i32
    %c0_i32_1 = arith.constant 0 : i32
    return %c0_i32, %c0_i32_0 : i32, i32
  }
  func.func @transform_5(%arg0: i32) -> (i32, i32) {
    %c0_i32 = arith.constant 0 : i32
    %c0_i32_0 = arith.constant 0 : i32
    return %arg0, %c0_i32 : i32, i32
  }
}

</mosaic_0001>

<bundles_post_ra>
// kernel: tpu_custom_call.1
= control target key start
LH: loop header
LB: loop body
LE: loop exit
PB: predicated region body
PF: predicated region fallthrough
CT: control target
= control target key end

     0   :  { %10 = vsyncpa [#allocation5], 0  ;;  %s2357_s0 = inlined_call_operand.vmem [shape: f32[64,16], index: 0, kind: input, shape index: {}]   ;;  %s2358_s1 = inlined_call_operand.vmem [shape: f32[16,384], index: 1, kind: input, shape index: {}]   ;;  %s2359_s2 = inlined_call_operand.hbm [shape: f32[128,384], index: 2, kind: input, shape index: {}]   ;;  %s2360_s3 = inlined_call_operand.vmem [shape: f32[1,384], index: 3, kind: input, shape index: {}]   ;;  %s2361_s4 = inlined_call_operand.vmem [shape: f32[1,384], index: 4, kind: input, shape index: {}]   ;;  %s2362_s5 = inlined_call_operand.hbm [shape: f32[64,128], index: 5, kind: output, shape index: {}]  }
   0x1   :  { %11 = vsyncpa [#allocation6], 0 }
   0x2   :  { %13 = vsyncpa [#allocation6 + $0x1], 0  ;;  %s1752_s18 = smov 0   ;;  %s1754_s19 = smov 0  }
   0x3   :  { %s1756_s20 = smov 0   ;;  %s1758_s21 = smov 0  }
   0x4 LB: > { %s1773_s22 = sadd.s32 4294967295, %s1711_s21   ;;  %s1289_s23 = sadd.s32 4294967294, %s1711_s21   ;;  %s1711_s21 = sphi %s1758_s21, %s2440_s21   ;;  %s1707_s20 = sphi %s1756_s20, %s2439_s20   ;;  %s1703_s19 = sphi %s1754_s19, %s2438_s19   ;;  %s1699_s18 = sphi %s1752_s18, %s2437_s18  }
   0x5   : > { %s1777_s24 = sadd.s32 1, %s1711_s21   ;;  %s136_s25 = sadd.s32 1, %s1707_s20 }
   0x6   : > { %s133_s26 = ssub.s32 %s1711_s21, %s1777_s24  ;;  %p146_p0 = scmp.ne.s32.totalorder %s1707_s20, %s1703_s19 }
   0x7   : > { %p134_p1 = scmp.eq.s32.totalorder %s133_s26, 0  ;;  %p147_p2 = scmp.eq.s32.totalorder %s1773_s22, 1 }
   0x8   : > { %p152_p3 = scmp.ne.s32.totalorder %s1703_s19, %s1699_s18  ;;  %p153_p4 = scmp.eq.s32.totalorder %s1289_s23, 1 }
   0x9   : > { %s1788_s27 = scalar_select %p134_p1, %s1707_s20, %s136_s25  }
   0xa   : > { %p1790_p5 = por %p147_p2, %p146_p0  ;;  %p1794_p6 = por %p153_p4, %p152_p3 }
   0xb   : > { %p1290_p7 = scmp.ge.s32.totalorder %s1711_s21, 1  ;;  %p160_p8 = scmp.lt.s32.totalorder %s1711_s21, 3 }
   0xc   : > { %s2387_s29 = scalar_select %p1794_p6, 1, 0 }
   0xd   : > { %p1554_p10 = scmp.eq.s32.totalorder %s1773_s22, 0  ;;  %p1802_p11 = pnand %p1290_p7, %p160_p8 }
   0xe   : > { %s1713_s6 = smov [#allocation4]  }
   0xf   : > { %s175_s7 = sshll.u32 %s1713_s6, 4  ;;  %p1546_p12 = pneg %p1802_p11  ;;  %s176_s7 = int_to_ptr.vmem [resolvable:$true] %s175_s7 }
  0x10   : > { %s1632_s8 = scalar_lea.vmem %s176_s7, 6144  ;;  %p1640_p4 = scmp.lt.s32.totalorder %s176_s7, %s176_s7 }
  0x11   : > { %p1547_p13 = pnand %p1554_p10, %p1546_p12  ;;  %p1633_p1 = scmp.ne.s32.totalorder %s176_s7, %s1632_s8 }
  0x12   : > { %p1641_p9 = scmp.lt.s32.totalorder %s1632_s8, %s1632_s8 }
  0x13   : > { %p1623_p0 = pneg %p1547_p13 }
  0x14   : > { %p1642_p6 = por %p1641_p9, %p1640_p4 }
  0x15   : > { %p1635_p2 = pnand %p1633_p1, %p1623_p0 }
  0x17   : > { %p1636_p3 = pneg %p1635_p2 }
  0x19   : > { %p1643_p7 = pnand %p1642_p6, %p1636_p3 }
  0x1b   : > { %1646 = shalt.err (!%p1643_p7)
}
  0x1c   : > { %s1714_s9 = smov 384   ;;  %s1715_s10 = smov 24  }
  0x1d   : > { %1549 = dma.hbm_to_vmem [thread:$0]  (!%p1547_p13), %s2359_s2, 6144, %s176_s7, [#allocation5], %s1714_s9, %s1714_s9, %s1715_s10  }
  0x1e   : > { %206 = sbr.rel (%p1802_p11) target bundleno = 1062 (0x426), region = 40 }
  0x23   : > { %1690 = dma.done.wait (%p1554_p10), [#allocation5], 6144  }
  0x24   : > { %1692 = vsyncadd (%p1554_p10), [#allocation5], 4294961152  ;;  %s231_s13 = sand.u32 1, %s1703_s19   ;;  %s1296_s14 = sshll.u32 %s1773_s22, 2 }
  0x25   : > { %s1295_s15 = sshll.u32 %s231_s13, 5  ;;  %p235_p6 = scmp.lt.s32.totalorder %s1296_s14, 7 }
  0x26   : > { %s1828_s26 = scalar_lea.vmem [#allocation7], %s1295_s15  ;;  %p2389_p8 = scmp.ne.s32.totalorder %s1773_s22, 0 }
  0x27   : > { %s2442_s14 = smov (!%p235_p6, %s1296_s14), 7 }
  0x28   : > { %s1297_s16 = sshll.u32 %s2442_s14, 3  ;;  %244 = sbr.rel (%p2389_p8) target bundleno = 47 (0x2f), region = 48 }
  0x29   : > { %s1826_s25 = scalar_lea.vmem %s2357_s0, %s1297_s16 }
  0x2d   : > { %v1716_v0 = vmov 0.0  }
  0x2e   : > { %245 = vst [vmem:[#allocation2] sm:$0xff] %v1716_v0 }
  0x2f PF: > { %v254_v1 = vld [vmem:[%s2358_s1 + $0x20] sm:$0xff]  ;;  %v253_v2 = vld [vmem:[%s2358_s1 + $0x18] sm:$0xff]  ;;  %v251_v3 = vld [vmem:[%s2358_s1 + $0x8] sm:$0xff]  ;;  %v2364_v5 = vmov 0.0   ;;  %vm273_vm0 = vcmask 130048   ;;  %vm1718_vm1 = vmmov 0   ;;  %v258_v61 = vlaneseq }
  0x30   : > { %314 = vmatprep.subr.mxu0 %v254_v1  ;;  %v250_v4 = vld [vmem:[%s2358_s1] sm:$0xff]  ;;  %350 = vmatprep.mubr.f32.mxu0 %v2364_v5  ;;  %v1846_v7 = vld [vmem:[#allocation4 + $0x170] sm:$0xff]  ;;  %v1849_v8 = vld [vmem:[#allocation4 + $0x168] sm:$0xff]  ;;  %s1315_s7 = sshll.u32 %s1773_s22, 9  ;;  %s1212_s8 = sshll.u32 %s1828_s26, 4  ;;  %s2312_s8 = int_to_ptr.vmem [resolvable:$true] %s1212_s8 }
  0x31   : > { %v246_v6 = vld [vmem:[%s1826_s25] sm:$0xff]  ;;  %315 = vmatpush1.msra.mxu0 %v253_v2  ;;  %2390 = vst [vmem:[#allocation10_spill] sm:$0xff] %v1846_v7  ;;  %v1855_v10 = vld [vmem:[#allocation4 + $0x150] sm:$0xff]  ;;  %v1858_v11 = vld [vmem:[#allocation4 + $0x140] sm:$0xff]  ;;  %v259_v62 = vshrl.u32 %v258_v61, 7  ;;  %s2310_s11 = scalar_lea.hbm %s2362_s5, %s1315_s7  ;;  %s2317_s12 = scalar_lea.sflag [#allocation6], %s231_s13 }
  0x32   : > { %1394 = vmatprep.mubr.msk.f32.mxu1 %vm273_vm0, %v246_v6  ;;  %316 = vmatprep.subr.mxu0 %v251_v3  ;;  %v1851_v9 = vld [vmem:[#allocation4 + $0x158] sm:$0xff]  ;;  %v255_v13 = vld [vmem:[%s2358_s1 + $0x28] sm:$0xff]  ;;  %v1868_v14 = vld [vmem:[#allocation4 + $0x128] sm:$0xff]  ;;  %s1647_s14 = scalar_lea.vmem %s2312_s8, 512  ;;  %s1719_s22 = smov [#allocation7]  }
  0x33   : > { %317 = vmatpush1.msra.mxu0 %v250_v4  ;;  %v1862_v12 = vld [vmem:[#allocation4 + $0x138] sm:$0xff]  ;;  %1390 = vmatprep.subr.mxu1 %v255_v13  ;;  %v247_v15 = vld [vmem:[%s1826_s25 + $0x8] sm:$0xff]  ;;  %v252_v16 = vld [vmem:[%s2358_s1 + $0x10] sm:$0xff]  ;;  %v260_v0 = vsub.s32 0, %v259_v62  ;;  %v264_v2 = vsub.s32 1, %v259_v62  ;;  %v268_v3 = vsub.s32 2, %v259_v62  ;;  %p1648_p9 = scmp.ne.s32.totalorder %s2312_s8, %s1647_s14 }
  0x34   : > { %1299 = vmatmul.mubr.msk.f32.vlgmr.msra.gmra.mxu0 %vm273_vm0, %v246_v6  ;;  %544 = vmatprep.subr.mxu0 %v1846_v7  ;;  %v1875_v17 = vld [vmem:[#allocation4 + $0x120] sm:$0xff]  ;;  %v1878_v18 = vld [vmem:[#allocation4 + $0x110] sm:$0xff]  ;;  %v1881_v19 = vld [vmem:[#allocation4 + $0x108] sm:$0xff]  ;;  %s1651_s15 = sshll.u32 %s1719_s22, 4  ;;  %s1652_s15 = int_to_ptr.vmem [resolvable:$false] %s1651_s15 }
  0x35   : > { %545 = vmatpush1.msra.mxu0 %v1849_v8  ;;  %356 = vmatprep.mubr.f32.mxu0 %v2364_v5  ;;  %v1885_v20 = vld [vmem:[#allocation4 + $0xf8] sm:$0xff]  ;;  %v1888_v21 = vld [vmem:[#allocation4 + $0xf0] sm:$0xff]  ;;  %v1894_v23 = vld [vmem:[#allocation4 + $0xe0] sm:$0xff]  ;;  %p1649_p10 = pnand %p1648_p9, %p1790_p5  ;;  %s1653_s16 = scalar_lea.vmem %s1652_s15, 1024 }
  0x36   : > { %546 = vmatprep.subr.mxu0 %v1851_v9  ;;  %1391 = vmatpush3.msra.mxu1 %v255_v13  ;;  %v1891_v22 = vld [vmem:[#allocation4 + $0x178] sm:$0xff]  ;;  %v1898_v24 = vld [vmem:[%s1826_s25 + $0x10] sm:$0xff]  ;;  %v1908_v27 = vld [vmem:[#allocation4 + $0x160] sm:$0xff]  ;;  %p1654_p12 = scmp.lt.s32.totalorder %s2312_s8, %s1652_s15  ;;  %p1655_p13 = scmp.lt.s32.totalorder %s1653_s16, %s1647_s14 }
  0x37   : > { %547 = vmatpush1.msra.mxu0 %v1855_v10  ;;  %1392 = vmatprep.subr.mxu1 %v252_v16  ;;  %v1901_v25 = vld [vmem:[#allocation4 + $0xd8] sm:$0xff]  ;;  %v1905_v26 = vld [vmem:[#allocation4 + $0xc8] sm:$0xff]  ;;  %v1911_v28 = vld [vmem:[#allocation4 + $0xc0] sm:$0xff]  ;;  %p1650_p11 = pneg %p1649_p10 }
  0x38   : > { %548 = vmatprep.subr.mxu0 %v1858_v11  ;;  %1300 = vmatmul.mubr.msk.f32.gmra.mxu0 %vm273_vm0, %v247_v15  ;;  %v1916_v29 = vld [vmem:[#allocation4 + $0xb0] sm:$0xff]  ;;  %v1920_v30 = vld [vmem:[#allocation4 + $0xa8] sm:$0xff]  ;;  %v1926_v32 = vld [vmem:[#allocation4 + $0x98] sm:$0xff]  ;;  %p1656_p0 = por %p1655_p13, %p1654_p12 }
  0x39   : > { %549 = vmatpush1.msra.mxu0 %v1862_v12  ;;  %1393 = vmatpush3.msra.mxu1 %v252_v16  ;;  %v1923_v31 = vld [vmem:[#allocation4 + $0x148] sm:$0xff]  ;;  %v249_v33 = vld [vmem:[%s1826_s25 + $0x18] sm:$0xff]  ;;  %v1935_v35 = vld [vmem:[#allocation4 + $0x80] sm:$0xff] }
  0x3a   : > { %550 = vmatprep.subr.mxu0 %v1868_v14  ;;  %1400 = vmatprep.subr.mxu1 %v2364_v5  ;;  %v1931_v34 = vld [vmem:[#allocation4 + $0x90] sm:$0xff]  ;;  %v1941_v37 = vld [vmem:[#allocation4 + $0x78] sm:$0xff]  ;;  %v1945_v38 = vld [vmem:[#allocation4 + $0x68] sm:$0xff]  ;;  %p1657_p1 = pnand %p1656_p0, %p1650_p11 }
  0x3b   : > { %551 = vmatpush1.msra.mxu0 %v1875_v17  ;;  %362 = vmatprep.mubr.f32.mxu0 %v2364_v5  ;;  %v1938_v36 = vld [vmem:[#allocation4 + $0x130] sm:$0xff]  ;;  %v1948_v39 = vld [vmem:[#allocation4 + $0x118] sm:$0xff]  ;;  %v1951_v40 = vld [vmem:[#allocation4 + $0x60] sm:$0xff] }
  0x3c   : > { %552 = vmatprep.subr.mxu0 %v1878_v18  ;;  %1395 = vmatmul.mubr.msk.f32.vlgmr.msra.gmra.mxu1 %vm273_vm0, %v247_v15  ;;  %v1955_v41 = vld [vmem:[#allocation4 + $0x50] sm:$0xff]  ;;  %v1959_v42 = vld [vmem:[#allocation4 + $0x48] sm:$0xff]  ;;  %v1962_v43 = vld [vmem:[#allocation4 + $0x100] sm:$0xff] }
  0x3d   : > { %553 = vmatpush1.msra.mxu0 %v1881_v19  ;;  %1401 = vmatpush3.msra.mxu1 %v1891_v22  ;;  %v1965_v44 = vld [vmem:[#allocation4 + $0x38] sm:$0xff]  ;;  %v1969_v45 = vld [vmem:[#allocation4 + $0x30] sm:$0xff]  ;;  %v1972_v46 = vld [vmem:[#allocation4 + $0xe8] sm:$0xff] }
  0x3e   : > { %554 = vmatprep.subr.mxu0 %v1885_v20  ;;  %1301 = vmatmul.mubr.msk.f32.gmra.mxu0 %vm273_vm0, %v1898_v24  ;;  %2391 = vst [vmem:[#allocation11_spill] sm:$0xff] %v1965_v44  ;;  %2392 = vst [vmem:[#allocation12_spill] sm:$0xff] %v1969_v45  ;;  %v1975_v47 = vld [vmem:[#allocation4 + $0x20] sm:$0xff]  ;;  %v1979_v48 = vld [vmem:[#allocation4 + $0x18] sm:$0xff] }
  0x3f   : > { %555 = vmatpush1.msra.mxu0 %v1888_v21  ;;  %1402 = vmatprep.subr.mxu1 %v2364_v5  ;;  %2393 = vst [vmem:[#allocation13_spill] sm:$0xff] %v1975_v47  ;;  %2394 = vst [vmem:[#allocation14_spill] sm:$0xff] %v1979_v48  ;;  %v1982_v49 = vld [vmem:[#allocation4 + $0xd0] sm:$0xff]  ;;  %v1985_v50 = vld [vmem:[#allocation4 + $0x8] sm:$0xff] }
  0x40   : > { %556 = vmatprep.subr.mxu0 %v1894_v23  ;;  %1403 = vmatpush3.msra.mxu1 %v1908_v27  ;;  %2395 = vst [vmem:[#allocation15_spill] sm:$0xff] %v1985_v50  ;;  %v1989_v51 = vld [vmem:[#allocation4] sm:$0xff]  ;;  %v1992_v52 = vld [vmem:[#allocation4 + $0xb8] sm:$0xff]  ;;  %v2006_v55 = vld [vmem:[#allocation4 + $0x88] sm:$0xff] }
  0x41   : > { %557 = vmatpush1.msra.mxu0 %v1901_v25  ;;  %1404 = vmatprep.subr.mxu1 %v2364_v5  ;;  %2396 = vst [vmem:[#allocation16_spill] sm:$0xff] %v1989_v51  ;;  %v1995_v53 = vld [vmem:[#allocation2] sm:$0xff]  ;;  %v2000_v54 = vld [vmem:[#allocation4 + $0xa0] sm:$0xff]  ;;  %v2012_v56 = vld [vmem:[#allocation4 + $0x70] sm:$0xff] }
  0x42   : > { %558 = vmatprep.subr.mxu0 %v1905_v26  ;;  %368 = vmatprep.mubr.f32.mxu0 %v2364_v5  ;;  %v2019_v57 = vld [vmem:[#allocation4 + $0x58] sm:$0xff]  ;;  %v2025_v58 = vld [vmem:[#allocation4 + $0x40] sm:$0xff]  ;;  %v2031_v59 = vld [vmem:[#allocation4 + $0x28] sm:$0xff] }
  0x43   : > { %559 = vmatpush1.msra.mxu0 %v1911_v28  ;;  %1405 = vmatpush3.msra.mxu1 %v1923_v31  ;;  %2397 = vst [vmem:[#allocation17_spill] sm:$0xff] %v2025_v58  ;;  %2398 = vst [vmem:[#allocation18_spill] sm:$0xff] %v2031_v59  ;;  %v2037_v60 = vld [vmem:[#allocation4 + $0x10] sm:$0xff]  ;;  %v256_v1 = vld [vmem:[%s2360_s3] sm:$0x7] }
  0x44   : > { %560 = vmatprep.subr.mxu0 %v1916_v29  ;;  %1302 = vmatmul.mubr.msk.f32.gmra.mxu0 %vm273_vm0, %v249_v33  ;;  %2399 = vst [vmem:[#allocation19_spill] sm:$0xff] %v2037_v60  ;;  %v261_v6 = vrot.slane %v256_v1, %v260_v0  ;;  %v265_v15 = vrot.slane %v256_v1, %v264_v2 }
  0x45   : > { %561 = vmatpush1.msra.mxu0 %v1920_v30  ;;  %1406 = vmatprep.subr.mxu1 %v2364_v5 }
  0x46   : > { %562 = vmatprep.subr.mxu0 %v1926_v32  ;;  %1407 = vmatpush3.msra.mxu1 %v1938_v36 }
  0x47   : > { %563 = vmatpush1.msra.mxu0 %v1931_v34  ;;  %1408 = vmatprep.subr.mxu1 %v2364_v5 }
  0x48   : > { %564 = vmatprep.subr.mxu0 %v1935_v35  ;;  %1409 = vmatpush3.msra.mxu1 %v1948_v39 }
  0x49   : > { %565 = vmatpush1.msra.mxu0 %v1941_v37  ;;  %1410 = vmatprep.subr.mxu1 %v2364_v5 }
  0x4a   : > { %566 = vmatprep.subr.mxu0 %v1945_v38  ;;  %608 = vmatprep.mubr.f32.mxu0 %v2364_v5 }
  0x4b   : > { %567 = vmatpush1.msra.mxu0 %v1951_v40  ;;  %1411 = vmatpush3.msra.mxu1 %v1962_v43 }
  0x4c   : > { %568 = vmatprep.subr.mxu0 %v1955_v41  ;;  %1412 = vmatprep.subr.mxu1 %v2364_v5 }
  0x4d   : > { %569 = vmatpush1.msra.mxu0 %v1959_v42  ;;  %1413 = vmatpush3.msra.mxu1 %v1972_v46 }
  0x4e   : > { %570 = vmatprep.subr.mxu0 %v1965_v44  ;;  %1414 = vmatprep.subr.mxu1 %v2364_v5 }
  0x4f   : > { %571 = vmatpush1.msra.mxu0 %v1969_v45  ;;  %1415 = vmatpush3.msra.mxu1 %v1982_v49 }
  0x50   : > { %572 = vmatprep.subr.mxu0 %v1975_v47  ;;  %1416 = vmatprep.subr.mxu1 %v2364_v5 }
  0x51   : > { %573 = vmatpush1.msra.mxu0 %v1979_v48  ;;  %1417 = vmatpush3.msra.mxu1 %v1992_v52 }
  0x52   : > { %574 = vmatprep.subr.mxu0 %v1985_v50  ;;  %1418 = vmatprep.subr.mxu1 %v2364_v5 }
  0x53   : > { %575 = vmatpush1.msra.mxu0 %v1989_v51  ;;  %1419 = vmatpush3.msra.mxu1 %v2000_v54 }
  0x54   : > { %609 = vmatmul.mubr.f32.vlgmr.msra.gmra.mxu0 %v1995_v53  ;;  %1397 = vmatprep.mubr.msk.f32.mxu1 %vm273_vm0, %v1898_v24  ;;  %v269_v24 = vrot.slane %v256_v1, %v268_v3  ;;  %v520_v1 = vld [vmem:[%s2361_s4] sm:$0x7] }
  0x55   : > { %1420 = vmatprep.subr.mxu1 %v2364_v5  ;;  %1398 = vmatmul.mubr.msk.f32.gmra.mxu1 %vm273_vm0, %v249_v33 }
  0x56   : > { %1421 = vmatpush3.msra.mxu1 %v2006_v55  ;;  %1432 = vmatprep.mubr.msk.f32.mxu1 %vm1718_vm1, %v2364_v5 }
  0x57   : > { %1422 = vmatprep.subr.mxu1 %v2364_v5  ;;  %708 = vmatprep.subr.mxu0 %v1846_v7 }
  0x58   : > { %1423 = vmatpush3.msra.mxu1 %v2012_v56  ;;  %709 = vmatpush1.msra.mxu0 %v1849_v8 }
  0x59   : > { %1424 = vmatprep.subr.mxu1 %v2364_v5  ;;  %710 = vmatprep.subr.mxu0 %v1851_v9 }
  0x5a   : > { %1425 = vmatpush3.msra.mxu1 %v2019_v57  ;;  %711 = vmatpush1.msra.mxu0 %v1855_v10 }
  0x5b   : > { %1426 = vmatprep.subr.mxu1 %v2364_v5  ;;  %712 = vmatprep.subr.mxu0 %v1858_v11 }
  0x5c   : > { %1427 = vmatpush3.msra.mxu1 %v2025_v58  ;;  %713 = vmatpush1.msra.mxu0 %v1862_v12 }
  0x5d   : > { %1428 = vmatprep.subr.mxu1 %v2364_v5  ;;  %714 = vmatprep.subr.mxu0 %v1868_v14 }
  0x5e   : > { %1429 = vmatpush3.msra.mxu1 %v2031_v59  ;;  %715 = vmatpush1.msra.mxu0 %v1875_v17 }
  0x5f   : > { %1430 = vmatprep.subr.mxu1 %v2364_v5  ;;  %716 = vmatprep.subr.mxu0 %v1878_v18 }
  0x60   : > { %1431 = vmatpush3.msra.mxu1 %v2037_v60  ;;  %717 = vmatpush1.msra.mxu0 %v1881_v19 }
  0x61   : > { %1433 = vmatmul.mubr.f32.vlgmr.msra.gmra.mxu1 %v1995_v53  ;;  %1435 = vmatprep.subr.mxu1 %v2364_v5 }
  0x62   : > { %1436 = vmatpush3.msra.mxu1 %v1891_v22  ;;  %718 = vmatprep.subr.mxu0 %v1885_v20 }
  0x63   : > { %1437 = vmatprep.subr.mxu1 %v2364_v5  ;;  %719 = vmatpush1.msra.mxu0 %v1888_v21 }
  0x64   : > { %1438 = vmatpush3.msra.mxu1 %v1908_v27  ;;  %720 = vmatprep.subr.mxu0 %v1894_v23 }
  0x65   : > { %1439 = vmatprep.subr.mxu1 %v2364_v5  ;;  %721 = vmatpush1.msra.mxu0 %v1901_v25 }
  0x66   : > { %1440 = vmatpush3.msra.mxu1 %v1923_v31  ;;  %722 = vmatprep.subr.mxu0 %v1905_v26 }
  0x67   : > { %1441 = vmatprep.subr.mxu1 %v2364_v5  ;;  %723 = vmatpush1.msra.mxu0 %v1911_v28 }
  0x68   : > { %1442 = vmatpush3.msra.mxu1 %v1938_v36  ;;  %724 = vmatprep.subr.mxu0 %v1916_v29 }
  0x69   : > { %1443 = vmatprep.subr.mxu1 %v2364_v5  ;;  %725 = vmatpush1.msra.mxu0 %v1920_v30 }
  0x6a   : > { %1444 = vmatpush3.msra.mxu1 %v1948_v39  ;;  %726 = vmatprep.subr.mxu0 %v1926_v32 }
  0x6b   : > { %1445 = vmatprep.subr.mxu1 %v2364_v5  ;;  %727 = vmatpush1.msra.mxu0 %v1931_v34 }
  0x6c   : > { %1446 = vmatpush3.msra.mxu1 %v1962_v43  ;;  %728 = vmatprep.subr.mxu0 %v1935_v35 }
  0x6d   : > { %1447 = vmatprep.subr.mxu1 %v2364_v5  ;;  %729 = vmatpush1.msra.mxu0 %v1941_v37 }
  0x6e   : > { %1448 = vmatpush3.msra.mxu1 %v1972_v46  ;;  %730 = vmatprep.subr.mxu0 %v1945_v38 }
  0x6f   : > { %1449 = vmatprep.subr.mxu1 %v2364_v5  ;;  %731 = vmatpush1.msra.mxu0 %v1951_v40 }
  0x70   : > { %1450 = vmatpush3.msra.mxu1 %v1982_v49  ;;  %732 = vmatprep.subr.mxu0 %v1955_v41 }
  0x71   : > { %1451 = vmatprep.subr.mxu1 %v2364_v5  ;;  %733 = vmatpush1.msra.mxu0 %v1959_v42 }
  0x72   : > { %1452 = vmatpush3.msra.mxu1 %v1992_v52  ;;  %734 = vmatprep.subr.mxu0 %v1965_v44 }
  0x73   : > { %1453 = vmatprep.subr.mxu1 %v2364_v5  ;;  %735 = vmatpush1.msra.mxu0 %v1969_v45 }
  0x74   : > { %1454 = vmatpush3.msra.mxu1 %v2000_v54  ;;  %736 = vmatprep.subr.mxu0 %v1975_v47 }
  0x75   : > { %1455 = vmatprep.subr.mxu1 %v2364_v5  ;;  %737 = vmatpush1.msra.mxu0 %v1979_v48 }
  0x76   : > { %1456 = vmatpush3.msra.mxu1 %v2006_v55  ;;  %738 = vmatprep.subr.mxu0 %v1985_v50 }
  0x77   : > { %1457 = vmatprep.subr.mxu1 %v2364_v5  ;;  %739 = vmatpush1.msra.mxu0 %v1989_v51 }
  0x78   : > { %1458 = vmatpush3.msra.mxu1 %v2012_v56  ;;  %772 = vmatprep.mubr.f32.mxu0 %v2364_v5 }
  0x79   : > { %1459 = vmatprep.subr.mxu1 %v2364_v5  ;;  %1467 = vmatprep.mubr.msk.f32.mxu1 %vm1718_vm1, %v2364_v5 }
  0x7a   : > { %1460 = vmatpush3.msra.mxu1 %v2019_v57  ;;  %873 = vmatprep.subr.mxu0 %v1846_v7 }
  0x7b   : > { %1461 = vmatprep.subr.mxu1 %v2364_v5 }
  0x7c   : > { %1462 = vmatpush3.msra.mxu1 %v2025_v58 }
  0x7d   : > { %1463 = vmatprep.subr.mxu1 %v2364_v5 }
  0x7e   : > { %1464 = vmatpush3.msra.mxu1 %v2031_v59 }
  0x7f   : > { %1465 = vmatprep.subr.mxu1 %v2364_v5 }
  0x80   : > { %1466 = vmatpush3.msra.mxu1 %v2037_v60 }
  0x81   : > { %1470 = vmatprep.subr.mxu1 %v2364_v5 }
  0xf4   : > { %v352_v63 = vpop.f32.mrf.mxu0 }
  0xf6   : > { %v354_v4 = vpop.f32.mrf.mxu0 }
  0xf8   : > { %v358_v13 = vpop.f32.mrf.mxu0 }
  0xf9   : > { %v2109_v16 = vadd.f32 %v358_v13, %v261_v6  ;;  %v2126_v13 = vrot.slane %v520_v1, %v260_v0 }
  0xfa   : > { %v360_v33 = vpop.f32.mrf.mxu0 }
  0xfb   : > { %2400 = vst [vmem:[#allocation20_spill] sm:$0xff] %v2109_v16  ;;  %v2111_v7 = vadd.f32 %v360_v33, %v265_v15  ;;  %v355_v16 = vadd.f32 %v354_v4, %v265_v15 }
  0xfc   : > { %v1396_v5 = vpop.f32.mrf.mxu1 }
  0xfd   : > { %2401 = vst [vmem:[#allocation21_spill] sm:$0xff] %v2111_v7  ;;  %v2113_v61 = vadd.f32 %v1396_v5, %v269_v24 }
  0xfe   : > { %v364_v60 = vpop.f32.mrf.mxu0  ;;  %v441_v5 = vpop.f32.mrf.mxu1 }
  0xff   : > { %2402 = vst [vmem:[#allocation22_spill] sm:$0xff] %v2113_v61  ;;  %v2115_v51 = vadd.f32 %v364_v60, %v261_v6  ;;  %v353_v61 = vadd.f32 %v352_v63, %v261_v6 }
 0x100   : > { %v366_v50 = vpop.f32.mrf.mxu0 }
 0x101   : > { %2403 = vst [vmem:[#allocation23_spill] sm:$0xff] %v2115_v51  ;;  %v2117_v59 = vadd.f32 %v366_v50, %v265_v15 }
 0x103   : > { %2404 = vst [vmem:[#allocation24_spill] sm:$0xff] %v2117_v59 }
 0x104   : > { %v370_v62 = vpop.f32.mrf.mxu0 }
 0x105   : > { %v2119_v48 = vadd.f32 %v370_v62, %v261_v6  ;;  %v2136_v6 = vrot.slane %v520_v1, %v268_v3 }
 0x106   : > { %v372_v47 = vpop.f32.mrf.mxu0 }
 0x107   : > { %2405 = vst [vmem:[#allocation25_spill] sm:$0xff] %v2119_v48  ;;  %v2121_v58 = vadd.f32 %v372_v47, %v265_v15  ;;  %v2133_v47 = vrot.slane %v520_v1, %v264_v2 }
 0x109   : > { %2406 = vst [vmem:[#allocation26_spill] sm:$0xff] %v2121_v58  ;;  %2409 = vst [vmem:[#allocation29_spill] sm:$0xff] %v2133_v47 }
 0x114   : > { %v610_v33 = vpop.f32.mrf.mxu0 }
 0x115   : > { %v611_v60 = vadd.f32 %v610_v33, %v2126_v13  ;;  %v1399_v51 = vpop.f32.mrf.mxu1 }
 0x116   : > { %v2129_v59 = vadd.f32 %v1399_v51, %v269_v24  ;;  %v612_v58 = vpop.f32.mrf.mxu0 }
 0x117   : > { %v685_v50 = vadd.f32 %v611_v60, %v353_v61  ;;  %v451_v62 = vpop.f32.mrf.mxu1  ;;  %v613_v0 = vadd.f32 %v612_v58, %v2133_v47 }
 0x118   : > { %2407 = vst [vmem:[#allocation27_spill] sm:$0xff] %v2129_v59  ;;  %v2131_v7 = vadd.f32 %v451_v62, %v269_v24 }
 0x119   : > { %v686_v48 = vmul.f32 0.5, %v685_v50  ;;  %v690_v44 = vadd.f32 %v613_v0, %v355_v16  ;;  %v2416_v0 = vld [vmem:[#allocation18_spill] sm:$0xff] }
 0x11a   : > { %2408 = vst [vmem:[#allocation28_spill] sm:$0xff] %v2131_v7 }
 0x11b   : > { %1597 = vtanh.f32 %v686_v48  ;;  %v691_v33 = vmul.f32 0.5, %v690_v44  ;;  %v442_v48 = vadd.f32 %v441_v5, %v269_v24  ;;  %v2410_v44 = vmov 0.0   ;;  %v2414_v24 = vld [vmem:[#allocation13_spill] sm:$0xff]  ;;  %v2415_v5 = vld [vmem:[#allocation14_spill] sm:$0xff] }
 0x11d   : > { %1599 = vtanh.f32 %v691_v33  ;;  %v2418_v33 = vld [vmem:[#allocation16_spill] sm:$0xff] }
 0x121   : > { %v681_v45 = vpop.f32.mrf.mxu1 }
 0x122   : > { %v682_v51 = vadd.f32 %v681_v45, %v2136_v6  ;;  %v2411_v45 = vld [vmem:[#allocation11_spill] sm:$0xff] }
 0x123   : > { %v1434_v63 = vpop.f32.mrf.mxu1 }
 0x124   : > { %v2417_v63 = vld [vmem:[#allocation15_spill] sm:$0xff] }
 0x128   : > { %v1598_v61 = vpop.eup %1597 }
 0x129   : > { %v688_v60 = vmul.f32 0.5, %v1598_v61  ;;  %v2419_v61 = vld [vmem:[#allocation19_spill] sm:$0xff] }
 0x12a   : > { %v1600_v59 = vpop.eup %1599 }
 0x12b   : > { %v689_v50 = vadd.f32 0.5, %v688_v60  ;;  %v693_v58 = vmul.f32 0.5, %v1600_v59  ;;  %v2413_v59 = vld [vmem:[#allocation17_spill] sm:$0xff] }
 0x12d   : > { %v695_v2 = vmul.f32 %v689_v50, %v682_v51  ;;  %v694_v15 = vadd.f32 0.5, %v693_v58  ;;  %v2420_v51 = vld [vmem:[#allocation10_spill] sm:$0xff] }
 0x12f   : > { %v696_v62 = vadd.f32 %v695_v2, %v442_v48 }
 0x131   : > { %1601 = vtanh.f32 %v696_v62  ;;  %v2421_v62 = vld [vmem:[#allocation20_spill] sm:$0xff] }
 0x13e   : > { %v1602_v4 = vpop.eup %1601 }
 0x13f   : > { %v698_v16 = vsub.f32 %v1995_v53, %v1602_v4  ;;  %v2412_v53 = vld [vmem:[#allocation12_spill] sm:$0xff] }
 0x141   : > { %v699_v3 = vmul.f32 %v698_v16, %v694_v15 }
 0x143   : > { %v2140_v1 = vadd.f32 %v1602_v4, %v699_v3  ;;  %v2422_v3 = vld [vmem:[#allocation21_spill] sm:$0xff] }
 0x145   : > { %701 = vst [vmem:[%s1828_s26] sm:$0xff] %v2140_v1  ;;  %773 = vmatmul.mubr.f32.vlgmr.msra.gmra.mxu0 %v2140_v1  ;;  %1468 = vmatmul.mubr.f32.vlgmr.msra.gmra.mxu1 %v2140_v1 }
 0x146   : > { %874 = vmatpush1.msra.mxu0 %v1849_v8  ;;  %1471 = vmatpush3.msra.mxu1 %v1891_v22 }
 0x147   : > { %875 = vmatprep.subr.mxu0 %v1851_v9  ;;  %1472 = vmatprep.subr.mxu1 %v2410_v44 }
 0x148   : > { %876 = vmatpush1.msra.mxu0 %v1855_v10  ;;  %1473 = vmatpush3.msra.mxu1 %v1908_v27 }
 0x149   : > { %877 = vmatprep.subr.mxu0 %v1858_v11  ;;  %1474 = vmatprep.subr.mxu1 %v2410_v44 }
 0x14a   : > { %878 = vmatpush1.msra.mxu0 %v1862_v12  ;;  %1475 = vmatpush3.msra.mxu1 %v1923_v31 }
 0x14b   : > { %879 = vmatprep.subr.mxu0 %v1868_v14  ;;  %1476 = vmatprep.subr.mxu1 %v2410_v44 }
 0x14c   : > { %880 = vmatpush1.msra.mxu0 %v1875_v17  ;;  %1477 = vmatpush3.msra.mxu1 %v1938_v36 }
 0x14d   : > { %881 = vmatprep.subr.mxu0 %v1878_v18  ;;  %1478 = vmatprep.subr.mxu1 %v2410_v44 }
 0x14e   : > { %882 = vmatpush1.msra.mxu0 %v1881_v19  ;;  %1479 = vmatpush3.msra.mxu1 %v1948_v39 }
 0x14f   : > { %883 = vmatprep.subr.mxu0 %v1885_v20  ;;  %1480 = vmatprep.subr.mxu1 %v2410_v44 }
 0x150   : > { %884 = vmatpush1.msra.mxu0 %v1888_v21  ;;  %1481 = vmatpush3.msra.mxu1 %v1962_v43 }
 0x151   : > { %885 = vmatprep.subr.mxu0 %v1894_v23  ;;  %1482 = vmatprep.subr.mxu1 %v2410_v44 }
 0x152   : > { %886 = vmatpush1.msra.mxu0 %v1901_v25  ;;  %1483 = vmatpush3.msra.mxu1 %v1972_v46 }
 0x153   : > { %887 = vmatprep.subr.mxu0 %v1905_v26  ;;  %1484 = vmatprep.subr.mxu1 %v2410_v44 }
 0x154   : > { %888 = vmatpush1.msra.mxu0 %v1911_v28  ;;  %1485 = vmatpush3.msra.mxu1 %v1982_v49 }
 0x155   : > { %889 = vmatprep.subr.mxu0 %v1916_v29  ;;  %1486 = vmatprep.subr.mxu1 %v2410_v44 }
 0x156   : > { %890 = vmatpush1.msra.mxu0 %v1920_v30  ;;  %1487 = vmatpush3.msra.mxu1 %v1992_v52 }
 0x157   : > { %891 = vmatprep.subr.mxu0 %v1926_v32  ;;  %1488 = vmatprep.subr.mxu1 %v2410_v44 }
 0x158   : > { %892 = vmatpush1.msra.mxu0 %v1931_v34  ;;  %1489 = vmatpush3.msra.mxu1 %v2000_v54 }
 0x159   : > { %893 = vmatprep.subr.mxu0 %v1935_v35  ;;  %1490 = vmatprep.subr.mxu1 %v2410_v44 }
 0x15a   : > { %894 = vmatpush1.msra.mxu0 %v1941_v37  ;;  %1491 = vmatpush3.msra.mxu1 %v2006_v55 }
 0x15b   : > { %895 = vmatprep.subr.mxu0 %v1945_v38  ;;  %1492 = vmatprep.subr.mxu1 %v2410_v44 }
 0x15c   : > { %896 = vmatpush1.msra.mxu0 %v1951_v40  ;;  %1493 = vmatpush3.msra.mxu1 %v2012_v56 }
 0x15d   : > { %897 = vmatprep.subr.mxu0 %v1955_v41  ;;  %1494 = vmatprep.subr.mxu1 %v2410_v44 }
 0x15e   : > { %898 = vmatpush1.msra.mxu0 %v1959_v42  ;;  %1495 = vmatpush3.msra.mxu1 %v2019_v57 }
 0x15f   : > { %899 = vmatprep.subr.mxu0 %v2411_v45  ;;  %1496 = vmatprep.subr.mxu1 %v2410_v44 }
 0x160   : > { %900 = vmatpush1.msra.mxu0 %v2412_v53  ;;  %1497 = vmatpush3.msra.mxu1 %v2413_v59 }
 0x161   : > { %901 = vmatprep.subr.mxu0 %v2414_v24  ;;  %1498 = vmatprep.subr.mxu1 %v2410_v44 }
 0x162   : > { %902 = vmatpush1.msra.mxu0 %v2415_v5  ;;  %1499 = vmatpush3.msra.mxu1 %v2416_v0 }
 0x163   : > { %903 = vmatprep.subr.mxu0 %v2417_v63  ;;  %1500 = vmatprep.subr.mxu1 %v2410_v44 }
 0x164   : > { %904 = vmatpush1.msra.mxu0 %v2418_v33  ;;  %937 = vmatprep.mubr.f32.mxu0 %v2410_v44 }
 0x165   : > { %1501 = vmatpush3.msra.mxu1 %v2419_v61  ;;  %1502 = vmatprep.mubr.msk.f32.mxu1 %vm1718_vm1, %v2410_v44 }
 0x166   : > { %1038 = vmatprep.subr.mxu0 %v2420_v51  ;;  %1505 = vmatprep.subr.mxu1 %v2410_v44 }
 0x205   : > { %v774_v60 = vpop.f32.mrf.mxu0  ;;  %v845_v50 = vpop.f32.mrf.mxu1 }
 0x206   : > { %v775_v48 = vadd.f32 %v774_v60, %v2126_v13  ;;  %v846_v63 = vadd.f32 %v845_v50, %v2136_v6  ;;  %v2423_v60 = vld [vmem:[#allocation22_spill] sm:$0xff] }
 0x207   : > { %v1469_v2 = vpop.f32.mrf.mxu1  ;;  %v776_v15 = vpop.f32.mrf.mxu0 }
 0x208   : > { %v849_v58 = vadd.f32 %v775_v48, %v2421_v62  ;;  %v777_v16 = vadd.f32 %v776_v15, %v2133_v47 }
 0x20a   : > { %v850_v4 = vmul.f32 0.5, %v849_v58  ;;  %v854_v7 = vadd.f32 %v777_v16, %v2422_v3 }
 0x20c   : > { %1603 = vtanh.f32 %v850_v4  ;;  %v855_v61 = vmul.f32 0.5, %v854_v7  ;;  %v2424_v7 = vld [vmem:[#allocation14_spill] sm:$0xff] }
 0x20e   : > { %1605 = vtanh.f32 %v855_v61 }
 0x219   : > { %v1604_v33 = vpop.eup %1603 }
 0x21a   : > { %v852_v51 = vmul.f32 0.5, %v1604_v33 }
 0x21b   : > { %v1606_v48 = vpop.eup %1605 }
 0x21c   : > { %v853_v0 = vadd.f32 0.5, %v852_v51  ;;  %v857_v62 = vmul.f32 0.5, %v1606_v48 }
 0x21e   : > { %v859_v5 = vmul.f32 %v853_v0, %v846_v63  ;;  %v858_v4 = vadd.f32 0.5, %v857_v62  ;;  %v2435_v63 = vld [vmem:[#allocation27_spill] sm:$0xff] }
 0x220   : > { %v860_v2 = vadd.f32 %v859_v5, %v2423_v60 }
 0x222   : > { %1607 = vtanh.f32 %v860_v2 }
 0x22f   : > { %v1608_v58 = vpop.eup %1607 }
 0x230   : > { %v862_v15 = vsub.f32 %v2140_v1, %v1608_v58 }
 0x232   : > { %v863_v47 = vmul.f32 %v862_v15, %v858_v4 }
 0x234   : > { %v2220_v16 = vadd.f32 %v1608_v58, %v863_v47 }
 0x236   : > { %1307 = vst [vmem:[%s1828_s26 + $0x8] sm:$0xff] %v2220_v16  ;;  %938 = vmatmul.mubr.f32.vlgmr.msra.gmra.mxu0 %v2220_v16  ;;  %1503 = vmatmul.mubr.f32.vlgmr.msra.gmra.mxu1 %v2220_v16 }
 0x237   : > { %1039 = vmatpush1.msra.mxu0 %v1849_v8  ;;  %1506 = vmatpush3.msra.mxu1 %v1891_v22  ;;  %v2425_v8 = vld [vmem:[#allocation18_spill] sm:$0xff] }
 0x238   : > { %1040 = vmatprep.subr.mxu0 %v1851_v9  ;;  %1507 = vmatprep.subr.mxu1 %v2410_v44  ;;  %v2426_v9 = vld [vmem:[#allocation15_spill] sm:$0xff] }
 0x239   : > { %1041 = vmatpush1.msra.mxu0 %v1855_v10  ;;  %1508 = vmatpush3.msra.mxu1 %v1908_v27  ;;  %v2427_v10 = vld [vmem:[#allocation16_spill] sm:$0xff] }
 0x23a   : > { %1042 = vmatprep.subr.mxu0 %v1858_v11  ;;  %1509 = vmatprep.subr.mxu1 %v2410_v44  ;;  %v2428_v11 = vld [vmem:[#allocation19_spill] sm:$0xff] }
 0x23b   : > { %1043 = vmatpush1.msra.mxu0 %v1862_v12  ;;  %1510 = vmatpush3.msra.mxu1 %v1923_v31 }
 0x23c   : > { %1044 = vmatprep.subr.mxu0 %v1868_v14  ;;  %1511 = vmatprep.subr.mxu1 %v2410_v44 }
 0x23d   : > { %1045 = vmatpush1.msra.mxu0 %v1875_v17  ;;  %1512 = vmatpush3.msra.mxu1 %v1938_v36 }
 0x23e   : > { %1046 = vmatprep.subr.mxu0 %v1878_v18  ;;  %1513 = vmatprep.subr.mxu1 %v2410_v44 }
 0x23f   : > { %1047 = vmatpush1.msra.mxu0 %v1881_v19  ;;  %1514 = vmatpush3.msra.mxu1 %v1948_v39  ;;  %v2429_v19 = vld [vmem:[#allocation23_spill] sm:$0xff] }
 0x240   : > { %1048 = vmatprep.subr.mxu0 %v1885_v20  ;;  %1515 = vmatprep.subr.mxu1 %v2410_v44 }
 0x241   : > { %1049 = vmatpush1.msra.mxu0 %v1888_v21  ;;  %1516 = vmatpush3.msra.mxu1 %v1962_v43 }
 0x242   : > { %1050 = vmatprep.subr.mxu0 %v1894_v23  ;;  %1517 = vmatprep.subr.mxu1 %v2410_v44  ;;  %v2430_v23 = vld [vmem:[#allocation29_spill] sm:$0xff] }
 0x243   : > { %1051 = vmatpush1.msra.mxu0 %v1901_v25  ;;  %1518 = vmatpush3.msra.mxu1 %v1972_v46 }
 0x244   : > { %1052 = vmatprep.subr.mxu0 %v1905_v26  ;;  %1519 = vmatprep.subr.mxu1 %v2410_v44  ;;  %v2431_v26 = vld [vmem:[#allocation24_spill] sm:$0xff] }
 0x245   : > { %1053 = vmatpush1.msra.mxu0 %v1911_v28  ;;  %1520 = vmatpush3.msra.mxu1 %v1982_v49 }
 0x246   : > { %1054 = vmatprep.subr.mxu0 %v1916_v29  ;;  %1521 = vmatprep.subr.mxu1 %v2410_v44 }
 0x247   : > { %1055 = vmatpush1.msra.mxu0 %v1920_v30  ;;  %1522 = vmatpush3.msra.mxu1 %v1992_v52 }
 0x248   : > { %1056 = vmatprep.subr.mxu0 %v1926_v32  ;;  %1523 = vmatprep.subr.mxu1 %v2410_v44 }
 0x249   : > { %1057 = vmatpush1.msra.mxu0 %v1931_v34  ;;  %1524 = vmatpush3.msra.mxu1 %v2000_v54 }
 0x24a   : > { %1058 = vmatprep.subr.mxu0 %v1935_v35  ;;  %1525 = vmatprep.subr.mxu1 %v2410_v44  ;;  %v2432_v35 = vld [vmem:[#allocation28_spill] sm:$0xff] }
 0x24b   : > { %1059 = vmatpush1.msra.mxu0 %v1941_v37  ;;  %1526 = vmatpush3.msra.mxu1 %v2006_v55  ;;  %v2433_v55 = vld [vmem:[#allocation25_spill] sm:$0xff] }
 0x24c   : > { %1060 = vmatprep.subr.mxu0 %v1945_v38  ;;  %1527 = vmatprep.subr.mxu1 %v2410_v44 }
 0x24d   : > { %1061 = vmatpush1.msra.mxu0 %v1951_v40  ;;  %1528 = vmatpush3.msra.mxu1 %v2012_v56 }
 0x24e   : > { %1062 = vmatprep.subr.mxu0 %v1955_v41  ;;  %1529 = vmatprep.subr.mxu1 %v2410_v44 }
 0x24f   : > { %1063 = vmatpush1.msra.mxu0 %v1959_v42  ;;  %1530 = vmatpush3.msra.mxu1 %v2019_v57 }
 0x250   : > { %1064 = vmatprep.subr.mxu0 %v2411_v45  ;;  %1531 = vmatprep.subr.mxu1 %v2410_v44 }
 0x251   : > { %1065 = vmatpush1.msra.mxu0 %v2412_v53  ;;  %1532 = vmatpush3.msra.mxu1 %v2413_v59 }
 0x252   : > { %1066 = vmatprep.subr.mxu0 %v2414_v24  ;;  %1533 = vmatprep.subr.mxu1 %v2410_v44 }
 0x253   : > { %1067 = vmatpush1.msra.mxu0 %v2424_v7  ;;  %1534 = vmatpush3.msra.mxu1 %v2425_v8 }
 0x254   : > { %1068 = vmatprep.subr.mxu0 %v2426_v9  ;;  %1535 = vmatprep.subr.mxu1 %v2410_v44 }
 0x255   : > { %1069 = vmatpush1.msra.mxu0 %v2427_v10  ;;  %1102 = vmatprep.mubr.f32.mxu0 %v2410_v44 }
 0x256   : > { %1536 = vmatpush3.msra.mxu1 %v2428_v11  ;;  %1537 = vmatprep.mubr.msk.f32.mxu1 %vm1718_vm1, %v2410_v44  ;;  %v2434_v44 = vld [vmem:[#allocation26_spill] sm:$0xff] }
 0x2f6   : > { %v939_v12 = vpop.f32.mrf.mxu0  ;;  %v1010_v14 = vpop.f32.mrf.mxu1 }
 0x2f7   : > { %v940_v17 = vadd.f32 %v939_v12, %v2126_v13  ;;  %v1011_v31 = vadd.f32 %v1010_v14, %v2136_v6 }
 0x2f8   : > { %v1504_v18 = vpop.f32.mrf.mxu1  ;;  %v941_v22 = vpop.f32.mrf.mxu0 }
 0x2f9   : > { %v1014_v20 = vadd.f32 %v940_v17, %v2429_v19  ;;  %v942_v25 = vadd.f32 %v941_v22, %v2430_v23 }
 0x2fb   : > { %v1015_v21 = vmul.f32 0.5, %v1014_v20  ;;  %v1019_v27 = vadd.f32 %v942_v25, %v2431_v26 }
 0x2fd   : > { %1609 = vtanh.f32 %v1015_v21  ;;  %v1020_v28 = vmul.f32 0.5, %v1019_v27 }
 0x2ff   : > { %1611 = vtanh.f32 %v1020_v28 }
 0x30a   : > { %v1610_v29 = vpop.eup %1609 }
 0x30b   : > { %v1017_v30 = vmul.f32 0.5, %v1610_v29 }
 0x30c   : > { %v1612_v37 = vpop.eup %1611 }
 0x30d   : > { %v1018_v32 = vadd.f32 0.5, %v1017_v30  ;;  %v1022_v38 = vmul.f32 0.5, %v1612_v37 }
 0x30f   : > { %v1024_v34 = vmul.f32 %v1018_v32, %v1011_v31  ;;  %v1023_v40 = vadd.f32 0.5, %v1022_v38 }
 0x311   : > { %v1025_v36 = vadd.f32 %v1024_v34, %v2432_v35 }
 0x313   : > { %1613 = vtanh.f32 %v1025_v36 }
 0x320   : > { %v1614_v39 = vpop.eup %1613 }
 0x321   : > { %v1027_v41 = vsub.f32 %v2220_v16, %v1614_v39 }
 0x323   : > { %v1028_v42 = vmul.f32 %v1027_v41, %v1023_v40 }
 0x325   : > { %v1029_v43 = vadd.f32 %v1614_v39, %v1028_v42 }
 0x327   : > { %1308 = vst [vmem:[%s1828_s26 + $0x10] sm:$0xff] %v1029_v43  ;;  %1103 = vmatmul.mubr.f32.vlgmr.msra.gmra.mxu0 %v1029_v43  ;;  %1538 = vmatmul.mubr.f32.vlgmr.msra.gmra.mxu1 %v1029_v43 }
 0x3e7   : > { %v1104_v46 = vpop.f32.mrf.mxu0  ;;  %v1175_v49 = vpop.f32.mrf.mxu1 }
 0x3e8   : > { %v1105_v52 = vadd.f32 %v1104_v46, %v2126_v13  ;;  %v1176_v5 = vadd.f32 %v1175_v49, %v2136_v6 }
 0x3e9   : > { %v1539_v54 = vpop.f32.mrf.mxu1  ;;  %v1106_v47 = vpop.f32.mrf.mxu0 }
 0x3ea   : > { %v1179_v56 = vadd.f32 %v1105_v52, %v2433_v55  ;;  %v1107_v1 = vadd.f32 %v1106_v47, %v2430_v23 }
 0x3ec   : > { %v1180_v57 = vmul.f32 0.5, %v1179_v56  ;;  %v1184_v45 = vadd.f32 %v1107_v1, %v2434_v44 }
 0x3ee   : > { %1615 = vtanh.f32 %v1180_v57  ;;  %v1185_v53 = vmul.f32 0.5, %v1184_v45 }
 0x3f0   : > { %1617 = vtanh.f32 %v1185_v53 }
 0x3fb   : > { %v1616_v59 = vpop.eup %1615 }
 0x3fc   : > { %v1182_v24 = vmul.f32 0.5, %v1616_v59 }
 0x3fd   : > { %v1618_v61 = vpop.eup %1617 }
 0x3fe   : > { %v1183_v0 = vadd.f32 0.5, %v1182_v24  ;;  %v1187_v50 = vmul.f32 0.5, %v1618_v61 }
 0x400   : > { %v1189_v13 = vmul.f32 %v1183_v0, %v1176_v5  ;;  %v1188_v51 = vadd.f32 0.5, %v1187_v50 }
 0x402   : > { %v1190_v33 = vadd.f32 %v1189_v13, %v2435_v63 }
 0x404   : > { %1619 = vtanh.f32 %v1190_v33 }
 0x411   : > { %v1620_v3 = vpop.eup %1619 }
 0x412   : > { %v1192_v60 = vsub.f32 %v1029_v43, %v1620_v3 }
 0x414   : > { %v1193_v2 = vmul.f32 %v1192_v60, %v1188_v51 }
 0x416   : > { %v1194_v6 = vadd.f32 %v1620_v3, %v1193_v2 }
 0x418   : > { %1309 = vst [vmem:[%s1828_s26 + $0x18] sm:$0xff] %v1194_v6  ;;  %1197 = vst [vmem:[#allocation2] sm:$0xff] %v1194_v6 }
 0x419   : > { %1660 = shalt.err (!%p1657_p1)
}
 0x41a   : > { %s1661_s13 = scalar_lea.hbm %s2310_s11, 512  ;;  %s1665_s23 = scalar_lea.hbm %s2362_s5, 1024 }
 0x41b   : > { %p1662_p2 = scmp.ne.s32.totalorder %s2310_s11, %s1661_s13  ;;  %p1666_p7 = scmp.lt.s32.totalorder %s2310_s11, %s2362_s5 }
 0x41c   : > { %p1667_p6 = scmp.lt.s32.totalorder %s1665_s23, %s1661_s13 }
 0x41d   : > { %p1663_p3 = pnand %p1662_p2, %p1790_p5 }
 0x41e   : > { %p1668_p8 = por %p1667_p6, %p1666_p7 }
 0x41f   : > { %p1664_p4 = pneg %p1663_p3 }
 0x421   : > { %p1669_p9 = pnand %p1668_p8, %p1664_p4 }
 0x423   : > { %1672 = shalt.err (!%p1669_p9)
}
 0x424   : > { %s1720_s6 = smov 128   ;;  %s1721_s7 = smov 8  }
 0x425   : > { %1544 = dma.vmem_to_hbm [thread:$0]  (%p1790_p5), %s2312_s8, 512, %s2310_s11, %s2317_s12, %s1720_s6, %s1720_s6, %s1721_s7  }
 0x426 PF: > { %p1556_p10 = scmp.ge.s32.totalorder %s1711_s21, 2  ;;  %s1227_s9 = sand.u32 1, %s1699_s18  }
 0x427   : > { %p2436_p11 = scmp.ne.s32.totalorder %s2387_s29, 0  ;;  %s1228_s10 = scalar_lea.sflag [#allocation6], %s1227_s9 }
 0x429   : > { %p1551_p12 = pnand %p1556_p10, %p2436_p11 }
 0x42b   : > { %p1552_p13 = pneg %p1551_p12 }
 0x42d   : > { %1694 = dma.done.wait (%p1552_p13), %s1228_s10, 512  }
 0x42e   : > { %1696 = vsyncadd (%p1552_p13), %s1228_s10, 4294966784  ;;  %p16_p0 = scmp.ge.s32.totalorder %s1777_s24, 4   ;;  %s2437_s18 = smov %s1703_s19 }
 0x42f   : > { %s2438_s19 = smov %s1707_s20  ;;  %s2439_s20 = smov %s1788_s27 }
 0x430   : > { %s2440_s21 = smov %s1777_s24  ;;  %18 = sbr.rel (!%p16_p0) target bundleno = 4 (0x4), region = 91 }
 0x435   :  { %1233 = vsyncpa [#allocation5], 1 }
 0x436   :  { %1235 = vsyncpa [#allocation5 + $0x1], 1 }
 0x437   :  { %1236 = vsyncpa [#allocation6], 1 }
 0x438   :  { %1238 = vsyncpa [#allocation6 + $0x1], 1 }

</bundles_post_ra>
